<compile_context>
chip_gen: v6e
topology: v6e:2x2x1
jax: 0.10.0
libtpu: 0.0.40
codegen_flags: <defaults>
</compile_context>

<pallas_src>
import jax
import jax.numpy as jnp
from jax.experimental import pallas as pl
from jax.experimental.pallas import tpu as pltpu


def _round_up(x, m):
    return (x + m - 1) // m * m


def _choose_tiles(batch, num_segments, feature_dim, npad,
                  budget_bytes=12 << 20, target_rows=1024):
    """Pick (tb, tk).

    tb is a multiple of 8 (layout-legal output tile), tk divides feature_dim.
    The combined double-buffered footprint is kept inside `budget_bytes` so the
    kernel fits v5e's 16 MiB default scoped VMEM and leaves ample headroom on
    v7x's 64 MiB physical VMEM.
    """
    # Contraction tile: prefer untiled so the (K, npad) weight block index is
    # constant across the whole grid (fetched from HBM once, stays resident).
    # Only tile K when its double-buffer would dominate the budget and halving
    # keeps it 128-aligned.
    tk = feature_dim
    if feature_dim % 128 == 0:
        while tk > 1024 and tk % 256 == 0 and 2 * tk * npad * 4 > budget_bytes // 2:
            tk //= 2

    # Batch tile: aim for ~target_rows input rows per block (>=512 rows is
    # where measured HBM roofline efficiency plateaus), bounded by VMEM.
    in_budget = max(budget_bytes - 2 * tk * npad * 4, 1 << 20)
    tb_vmem = in_budget // (2 * num_segments * tk * 4)   # double-buffered inputs
    tb_rows = pl.cdiv(target_rows, num_segments)
    tb = min(tb_vmem, tb_rows, _round_up(batch, 8))
    tb = max(8, (tb // 8) * 8)
    return int(tb), int(tk)


def _kernel_single_k(x_ref, w_ref, b_ref, o_ref):
    # x_ref: (tb, S, K)  w_ref: (K, npad)  b_ref: (1, npad)  o_ref: (tb, npad)
    # Average consensus is linear and the 1/S scale is folded into w_ref, so a
    # plain segment SUM before the matmul is exact (up to FP reordering).
    xs = jnp.sum(x_ref[...], axis=1)                       # (tb, K) sublane reduce
    o_ref[...] = (jnp.dot(xs, w_ref[...], preferred_element_type=jnp.float32)
                  + b_ref[...]).astype(o_ref.dtype)


def _kernel_multi_k(x_ref, w_ref, b_ref, o_ref):
    # K-tiled variant: accumulate directly into the resident f32 output block
    # (its block index is constant over the k axis); bias folded into the init.
    xs = jnp.sum(x_ref[...], axis=1)                       # (tb, tk)

    @pl.when(pl.program_id(1) == 0)
    def _init():
        o_ref[...] = jnp.broadcast_to(b_ref[...], o_ref.shape).astype(o_ref.dtype)

    o_ref[...] += jnp.dot(xs, w_ref[...], preferred_element_type=jnp.float32)


def prepare_classifier_params(weight, bias, num_segments):
    """One-time (per-parameter) preprocessing, hoisted out of the forward:
    pre-transpose the weight to (K, N), fold in the 1/num_segments consensus
    scale, and zero-pad the class dim to a lane-dense multiple of 128."""
    num_class, feature_dim = weight.shape
    npad = _round_up(num_class, 128)
    w_kn = jnp.zeros((feature_dim, npad), weight.dtype)
    w_kn = w_kn.at[:, :num_class].set(weight.T / num_segments)
    b_pad = jnp.zeros((1, npad), bias.dtype).at[0, :num_class].set(bias)
    return w_kn, b_pad, num_class


def classification_network_forward(inputs, w_kn, b_pad, num_class, num_segments):
    """inputs: (batch*num_segments, feature_dim) float32
       w_kn:   (feature_dim, npad) pre-transposed, pre-scaled, zero-padded weight
       b_pad:  (1, npad) zero-padded bias
       returns {'logits': (batch, num_class)}"""
    n, feature_dim = inputs.shape
    assert n % num_segments == 0
    batch = n // num_segments
    npad = w_kn.shape[1]

    tb, tk = _choose_tiles(batch, num_segments, feature_dim, npad)
    batch_pad = _round_up(batch, tb)

    # Wrapper-side reshape (free) + optional zero-pad of the batch dim so the
    # grid divides evenly; padded rows only produce extra output rows which are
    # sliced off below.
    x3 = inputs.reshape(batch, num_segments, feature_dim)
    if batch_pad != batch:
        x3 = jnp.pad(x3, ((0, batch_pad - batch), (0, 0), (0, 0)))

    grid_i = batch_pad // tb
    grid_k = feature_dim // tk

    if grid_k == 1:
        grid = (grid_i,)
        in_specs = [
            pl.BlockSpec((tb, num_segments, tk), lambda i: (i, 0, 0)),  # inputs
            pl.BlockSpec((tk, npad), lambda i: (0, 0)),                 # weight (K,N)
            pl.BlockSpec((1, npad), lambda i: (0, 0)),                  # bias
        ]
        out_spec = pl.BlockSpec((tb, npad), lambda i: (i, 0))
        kernel = _kernel_single_k
        dims = ("parallel",)
        weight_reads = 1            # constant block index -> fetched once
    else:
        grid = (grid_i, grid_k)
        in_specs = [
            pl.BlockSpec((tb, num_segments, tk), lambda i, k: (i, 0, k)),
            pl.BlockSpec((tk, npad), lambda i, k: (k, 0)),
            pl.BlockSpec((1, npad), lambda i, k: (0, 0)),
        ]
        out_spec = pl.BlockSpec((tb, npad), lambda i, k: (i, 0))
        kernel = _kernel_multi_k
        dims = ("parallel", "arbitrary")
        weight_reads = grid_i       # weight re-streamed once per batch tile

    cost = pl.CostEstimate(
        flops=2 * batch_pad * feature_dim * npad            # matmul
              + batch_pad * num_segments * feature_dim,     # segment sum
        transcendentals=0,
        bytes_accessed=4 * (batch_pad * num_segments * feature_dim
                            + weight_reads * feature_dim * npad
                            + npad
                            + batch_pad * npad),
    )

    # Double-buffered footprint estimate -> explicit scoped-VMEM limit
    # (raises v5e's 16 MiB default when needed, capped well under v7x's
    # 64 MiB physical VMEM).
    est_vmem = 4 * (2 * tb * num_segments * tk + 2 * tk * npad
                    + 2 * npad + 2 * tb * npad)
    vmem_limit = int(min(max(2 * est_vmem, 32 << 20), 48 << 20))

    logits_pad = pl.pallas_call(
        kernel,
        out_shape=jax.ShapeDtypeStruct((batch_pad, npad), jnp.float32),
        grid_spec=pltpu.PrefetchScalarGridSpec(
            num_scalar_prefetch=0,
            grid=grid,
            in_specs=in_specs,
            out_specs=out_spec,
        ),
        compiler_params=pltpu.CompilerParams(
            dimension_semantics=dims,
            vmem_limit_bytes=vmem_limit,
        ),
        cost_estimate=cost,
    )(x3, w_kn, b_pad)

    return {"logits": logits_pad[:batch, :num_class]}


if __name__ == "__main__":
    # Small, forward-consistent shapes.
    batch = 2
    num_segments = 8
    feature_dim = 32
    num_class = 10

    key = jax.random.PRNGKey(0)
    k_x, k_w = jax.random.split(key)

    # inputs to fc_action: (batch * num_segments, feature_dim)
    x = jax.random.normal(k_x, (batch * num_segments, feature_dim), dtype=jnp.float32)

    # Deterministic parameter init matching __init__: normal_(W, 0, 0.001), constant_(b, 0)
    weight = 0.001 * jax.random.normal(k_w, (num_class, feature_dim), dtype=jnp.float32)
    bias = jnp.zeros((num_class,), dtype=jnp.float32)

    w_kn, b_pad, nc = prepare_classifier_params(weight, bias, num_segments)
    out = classification_network_forward(x, w_kn, b_pad, nc, num_segments)
    logits = jax.block_until_ready(out["logits"])

    # Pure-JAX reference (same math as the PyTorch forward: matmul -> reshape -> mean).
    ref = (x @ weight.T + bias).reshape(batch, num_segments, num_class).mean(axis=1)
    assert logits.shape == (batch, num_class)
    assert jnp.allclose(logits, ref, atol=1e-5, rtol=1e-5), float(jnp.max(jnp.abs(logits - ref)))

    print("KERNEL_OK")
</pallas_src>

<mosaic_0001>
module attributes {stable_mosaic.version = 11 : i64} {
  func.func @_kernel_single_k(%arg0: i32, %arg1: memref<8x8x32xf32, #tpu.memory_space<vmem>>, %arg2: memref<32x128xf32, #tpu.memory_space<vmem>>, %arg3: memref<1x128xf32, #tpu.memory_space<vmem>>, %arg4: memref<8x128xf32, #tpu.memory_space<vmem>>) attributes {dimension_semantics = [#tpu.dimension_semantics<parallel>], iteration_bounds = array<i64: 1>, scalar_prefetch = 0 : i64, scratch_operands = 0 : i64, tpu.core_type = #tpu.core_type<tc>, window_params = [{transform_indices = @transform_0, window_bounds = array<i64: 8, 8, 32>}, {pipeline_mode = #tpu.pipeline_mode<synchronous>, transform_indices = @transform_1, window_bounds = array<i64: 32, 128>}, {pipeline_mode = #tpu.pipeline_mode<synchronous>, transform_indices = @transform_2, window_bounds = array<i64: 1, 128>}, {transform_indices = @transform_3, window_bounds = array<i64: 8, 128>}]} {
    %c0 = arith.constant 0 : index
    %c0_0 = arith.constant 0 : index
    %c0_1 = arith.constant 0 : index
    %0 = vector.load %arg1[%c0, %c0_0, %c0_1] : memref<8x8x32xf32, #tpu.memory_space<vmem>>, vector<8x8x32xf32>
    %cst = arith.constant dense<0.000000e+00> : vector<8x32xf32>
    %1 = vector.multi_reduction <add>, %0, %cst [1] : vector<8x8x32xf32> to vector<8x32xf32>
    %c0_2 = arith.constant 0 : index
    %c0_3 = arith.constant 0 : index
    %2 = vector.load %arg2[%c0_2, %c0_3] : memref<32x128xf32, #tpu.memory_space<vmem>>, vector<32x128xf32>
    %cst_4 = arith.constant dense<0.000000e+00> : vector<8x128xf32>
    %3 = tpu.matmul %1, %2, %cst_4 {dimension_numbers = #tpu.dot_dimension_numbers<[1], [0], [0], [1], [0, 0, 1, 1], [], []>} : vector<8x32xf32>, vector<32x128xf32>, vector<8x128xf32> -> vector<8x128xf32>
    %c0_5 = arith.constant 0 : index
    %c0_6 = arith.constant 0 : index
    %4 = vector.load %arg3[%c0_5, %c0_6] : memref<1x128xf32, #tpu.memory_space<vmem>>, vector<1x128xf32>
    %5 = vector.broadcast %4 : vector<1x128xf32> to vector<8x128xf32>
    %6 = arith.addf %3, %5 : vector<8x128xf32>
    %c0_7 = arith.constant 0 : index
    %c0_8 = arith.constant 0 : index
    %7 = vector.load %arg4[%c0_7, %c0_8] : memref<8x128xf32, #tpu.memory_space<vmem>>, vector<8x128xf32>
    tpu.vector_store %arg4[%c0_7, %c0_8], %6 {strides = array<i32>} : memref<8x128xf32, #tpu.memory_space<vmem>>, vector<8x128xf32>,
    return
  }
  func.func @transform_0(%arg0: i32) -> (i32, i32, i32) {
    %c0_i32 = arith.constant 0 : i32
    %c0_i32_0 = arith.constant 0 : i32
    %c0_i32_1 = arith.constant 0 : i32
    return %arg0, %c0_i32, %c0_i32_0 : i32, i32, i32
  }
  func.func @transform_1(%arg0: i32) -> (i32, i32) {
    %c0_i32 = arith.constant 0 : i32
    %c0_i32_0 = arith.constant 0 : i32
    %c0_i32_1 = arith.constant 0 : i32
    return %c0_i32, %c0_i32_0 : i32, i32
  }
  func.func @transform_2(%arg0: i32) -> (i32, i32) {
    %c0_i32 = arith.constant 0 : i32
    %c0_i32_0 = arith.constant 0 : i32
    %c0_i32_1 = arith.constant 0 : i32
    return %c0_i32, %c0_i32_0 : i32, i32
  }
  func.func @transform_3(%arg0: i32) -> (i32, i32) {
    %c0_i32 = arith.constant 0 : i32
    %c0_i32_0 = arith.constant 0 : i32
    return %arg0, %c0_i32 : i32, i32
  }
}

</mosaic_0001>

<bundles_post_ra>
// kernel: tpu_custom_call.1
= control target key start
LH: loop header
LB: loop body
LE: loop exit
PB: predicated region body
PF: predicated region fallthrough
CT: control target
= control target key end

     0   :  { %8 = vsyncpa [#allocation3], 0  ;;  %s373_s0 = inlined_call_operand.hbm [shape: f32[8,8,32], index: 0, kind: input, shape index: {}]   ;;  %s374_s1 = inlined_call_operand.hbm [shape: f32[32,128], index: 1, kind: input, shape index: {}]   ;;  %s375_s2 = inlined_call_operand.vmem [shape: f32[1,128], index: 2, kind: input, shape index: {}]   ;;  %s376_s3 = inlined_call_operand.hbm [shape: f32[8,128], index: 3, kind: output, shape index: {}]  }
   0x1   :  { %9 = vsyncpa [#allocation6], 0 }
   0x2   :  { %10 = vsyncpa [#allocation4], 0  ;;  %s321_s12 = smov [#allocation2]  }
   0x3   :  { %s16_s13 = sshll.u32 %s321_s12, 4  ;;  %s17_s13 = int_to_ptr.vmem [resolvable:$true] %s16_s13 }
   0x4   :  { %s263_s14 = scalar_lea.vmem %s17_s13, 1024  ;;  %p268_p1 = scmp.lt.s32.totalorder %s17_s13, %s17_s13 }
   0x5   :  { %p264_p0 = scmp.ne.s32.totalorder %s17_s13, %s263_s14  ;;  %p269_p2 = scmp.lt.s32.totalorder %s263_s14, %s263_s14 }
   0x7   :  { %p270_p3 = por %p269_p2, %p268_p1 }
   0x9   :  { %p271_p4 = pnand %p270_p3, %p264_p0 }
   0xb   :  { %274 = shalt.err (!%p271_p4)
}
   0xc   :  { %s322_s15 = smov 128   ;;  %s323_s16 = smov 8  }
   0xd   :  { %22 = dma.hbm_to_vmem [thread:$0]  %s373_s0, 1024, %s17_s13, [#allocation3], %s322_s15, %s322_s15, %s323_s16  }
   0xe   :  { %s324_s19 = smov [#allocation5]  }
   0xf   :  { %s28_s20 = sshll.u32 %s324_s19, 4  ;;  %s29_s20 = int_to_ptr.vmem [resolvable:$true] %s28_s20 }
  0x10   :  { %s283_s21 = scalar_lea.vmem %s29_s20, 512  ;;  %p288_p6 = scmp.lt.s32.totalorder %s29_s20, %s29_s20 }
  0x11   :  { %p284_p5 = scmp.ne.s32.totalorder %s29_s20, %s283_s21  ;;  %p289_p7 = scmp.lt.s32.totalorder %s283_s21, %s283_s21 }
  0x13   :  { %p290_p8 = por %p289_p7, %p288_p6 }
  0x15   :  { %p291_p9 = pnand %p290_p8, %p284_p5 }
  0x17   :  { %294 = shalt.err (!%p291_p9)
}
  0x18   :  { %34 = dma.hbm_to_vmem [thread:$0]  %s374_s1, 512, %s29_s20, [#allocation6], %s322_s15, %s322_s15, %s323_s16  }
  0x19   :  { %315 = dma.done.wait [#allocation3], 1024  }
  0x1a   :  { %316 = vsyncadd [#allocation3], 4294966272 }
  0x1b   :  { %317 = dma.done.wait [#allocation6], 512  }
  0x1c   :  { %318 = vsyncadd [#allocation6], 4294966784  ;;  %v325_v0 = vmov 0.0   ;;  %vm326_vm0 = vmmov 0   ;;  %vm51_vm1 = vcmask 261120   ;;  %v111_v1 = vld [vmem:[#allocation5 + $0x18] sm:$0xff] }
  0x1d   :  { %237 = vmatprep.subr.mxu0 %v325_v0  ;;  %245 = vmatprep.mubr.msk.f32.mxu0 %vm326_vm0, %v325_v0  ;;  %v110_v2 = vld [vmem:[#allocation5 + $0x10] sm:$0xff]  ;;  %v109_v3 = vld [vmem:[#allocation5 + $0x8] sm:$0xff]  ;;  %v43_v4 = vld [vmem:[#allocation2] sm:$0xff]  ;;  %vm127_vm2 = vcmask 1041409   ;;  %vm129_vm3 = vcmask 1042434   ;;  %vm131_vm4 = vcmask 1043459  }
  0x1e   :  { %238 = vmatpush3.msra.mxu0 %v111_v1  ;;  %v44_v5 = vld [vmem:[#allocation2 + $0x8] sm:$0xff]  ;;  %v45_v6 = vld [vmem:[#allocation2 + $0x10] sm:$0xff]  ;;  %v46_v7 = vld [vmem:[#allocation2 + $0x18] sm:$0xff]  ;;  %v52_v9 = vsel %vm51_vm1, %v43_v4, 0.0  ;;  %vm133_vm5 = vcmask 1044484   ;;  %vm135_vm6 = vcmask 1045509  }
  0x1f   :  { %239 = vmatprep.subr.mxu0 %v325_v0  ;;  %v47_v8 = vld [vmem:[#allocation2 + $0x20] sm:$0xff]  ;;  %v59_v10 = vsel %vm51_vm1, %v44_v5, 0.0  ;;  %v48_v11 = vld [vmem:[#allocation2 + $0x28] sm:$0xff]  ;;  %v49_v12 = vld [vmem:[#allocation2 + $0x30] sm:$0xff]  ;;  %v53_v14 = vrot.slane %v52_v9, 4  ;;  %v66_v16 = vsel %vm51_vm1, %v45_v6, 0.0 }
  0x20   :  { %240 = vmatpush3.msra.mxu0 %v110_v2  ;;  %v50_v13 = vld [vmem:[#allocation2 + $0x38] sm:$0xff]  ;;  %v60_v15 = vrot.slane %v59_v10, 4  ;;  %v108_v17 = vld [vmem:[#allocation5] sm:$0xff]  ;;  %v67_v18 = vrot.slane %v66_v16, 4  ;;  %v73_v19 = vsel %vm51_vm1, %v46_v7, 0.0  ;;  %v80_v20 = vsel %vm51_vm1, %v47_v8, 0.0 }
  0x21   :  { %241 = vmatprep.subr.mxu0 %v325_v0  ;;  %v87_v21 = vsel %vm51_vm1, %v48_v11, 0.0  ;;  %v54_v22 = vadd.f32 %v53_v14, %v52_v9  ;;  %v74_v24 = vrot.slane %v73_v19, 4  ;;  %v81_v25 = vrot.slane %v80_v20, 4  ;;  %s327_s24 = smov [#allocation7]  }
  0x22   :  { %242 = vmatpush3.msra.mxu0 %v109_v3  ;;  %v61_v23 = vadd.f32 %v60_v15, %v59_v10  ;;  %v68_v26 = vadd.f32 %v67_v18, %v66_v16  ;;  %v88_v27 = vrot.slane %v87_v21, 4  ;;  %v94_v28 = vsel %vm51_vm1, %v49_v12, 0.0  ;;  %v230_v12 = vld [vmem:[%s375_s2] ss:$0 sm:$0xff]  ;;  %s220_s25 = sshll.u32 %s327_s24, 4  ;;  %s221_s25 = int_to_ptr.vmem [resolvable:$true] %s220_s25 }
  0x23   :  { %243 = vmatprep.subr.mxu0 %v325_v0  ;;  %v101_v29 = vsel %vm51_vm1, %v50_v13, 0.0  ;;  %v55_v30 = vrot.slane %v54_v22, 2  ;;  %v75_v32 = vadd.f32 %v74_v24, %v73_v19  ;;  %v82_v33 = vadd.f32 %v81_v25, %v80_v20  ;;  %s295_s26 = scalar_lea.vmem %s221_s25, 128  ;;  %p300_p11 = scmp.lt.s32.totalorder %s221_s25, %s221_s25 }
  0x24   :  { %244 = vmatpush3.msra.mxu0 %v108_v17  ;;  %v62_v31 = vrot.slane %v61_v23, 2  ;;  %v69_v34 = vrot.slane %v68_v26, 2  ;;  %v89_v35 = vadd.f32 %v88_v27, %v87_v21  ;;  %v95_v36 = vrot.slane %v94_v28, 4  ;;  %p296_p10 = scmp.ne.s32.totalorder %s221_s25, %s295_s26  ;;  %p301_p12 = scmp.lt.s32.totalorder %s295_s26, %s295_s26 }
  0x25   :  { %v102_v37 = vrot.slane %v101_v29, 4  ;;  %v56_v38 = vadd.f32 %v55_v30, %v54_v22  ;;  %v76_v40 = vrot.slane %v75_v32, 2  ;;  %v83_v41 = vrot.slane %v82_v33, 2 }
  0x26   :  { %v63_v39 = vadd.f32 %v62_v31, %v61_v23  ;;  %v70_v42 = vadd.f32 %v69_v34, %v68_v26  ;;  %v90_v43 = vrot.slane %v89_v35, 2  ;;  %v96_v44 = vadd.f32 %v95_v36, %v94_v28  ;;  %p302_p13 = por %p301_p12, %p300_p11 }
  0x27   :  { %v103_v45 = vadd.f32 %v102_v37, %v101_v29  ;;  %v57_v46 = vrot.slane %v56_v38, 1  ;;  %v77_v48 = vadd.f32 %v76_v40, %v75_v32  ;;  %v84_v49 = vadd.f32 %v83_v41, %v82_v33 }
  0x28   :  { %v64_v47 = vrot.slane %v63_v39, 1  ;;  %v71_v50 = vrot.slane %v70_v42, 1  ;;  %v91_v51 = vadd.f32 %v90_v43, %v89_v35  ;;  %v97_v52 = vrot.slane %v96_v44, 2  ;;  %p303_p0 = pnand %p302_p13, %p296_p10 }
  0x29   :  { %v104_v53 = vrot.slane %v103_v45, 2  ;;  %v58_v54 = vadd.f32 %v57_v46, %v56_v38  ;;  %v78_v56 = vrot.slane %v77_v48, 1  ;;  %v85_v57 = vrot.slane %v84_v49, 1 }
  0x2a   :  { %v65_v55 = vadd.f32 %v64_v47, %v63_v39  ;;  %v72_v58 = vadd.f32 %v71_v50, %v70_v42  ;;  %v92_v59 = vrot.slane %v91_v51, 1  ;;  %v98_v60 = vadd.f32 %v97_v52, %v96_v44 }
  0x2b   :  { %v105_v61 = vadd.f32 %v104_v53, %v103_v45  ;;  %v79_v62 = vadd.f32 %v78_v56, %v77_v48  ;;  %v86_v63 = vadd.f32 %v85_v57, %v84_v49  ;;  %vm137_vm7 = vcmask 1046534  }
  0x2c   :  { %v128_v0 = vsel %vm127_vm2, %v65_v55, %v58_v54  ;;  %v93_v1 = vadd.f32 %v92_v59, %v91_v51  ;;  %v99_v2 = vrot.slane %v98_v60, 1  ;;  %vm139_vm8 = vcmask 1047559  }
  0x2d   :  { %v106_v3 = vrot.slane %v105_v61, 1  ;;  %v130_v4 = vsel %vm129_vm3, %v72_v58, %v128_v0 }
  0x2e   :  { %v132_v5 = vsel %vm131_vm4, %v79_v62, %v130_v4  ;;  %v100_v6 = vadd.f32 %v99_v2, %v98_v60 }
  0x2f   :  { %v107_v7 = vadd.f32 %v106_v3, %v105_v61  ;;  %v134_v8 = vsel %vm133_vm5, %v86_v63, %v132_v5 }
  0x30   :  { %v136_v9 = vsel %vm135_vm6, %v93_v1, %v134_v8 }
  0x31   :  { %v138_v10 = vsel %vm137_vm7, %v100_v6, %v136_v9 }
  0x32   :  { %v140_v11 = vsel %vm139_vm8, %v107_v7, %v138_v10 }
  0x33   :  { %246 = vmatmul.mubr.msk.f32.vlgmr.msra.gmra.mxu0 %vm51_vm1, %v140_v11 }
  0xf3   :  { %v209_v13 = vpop.f32.mrf.mxu0 }
  0xf4   :  { %v210_v14 = vadd.f32 %v230_v12, %v209_v13 }
  0xf5   :  { %v247_v15 = vpop.f32.mrf.mxu0 }
  0xf6   :  { %213 = vst [vmem:[#allocation7] sm:$0xff] %v210_v14 }
  0xf7   :  { %306 = shalt.err (!%p303_p0)
}
  0xf8   :  { %223 = dma.vmem_to_hbm [thread:$0]  %s221_s25, 128, %s376_s3, [#allocation4]  }
  0xf9   :  { %319 = dma.done.wait [#allocation4], 128  }
  0xfa   :  { %320 = vsyncadd [#allocation4], 4294967168 }
  0xfb   :  { %227 = vsyncpa [#allocation3], 1 }
  0xfc   :  { %228 = vsyncpa [#allocation6], 1 }
  0xfd   :  { %229 = vsyncpa [#allocation4], 1 }

</bundles_post_ra>
